<compile_context>
chip_gen: v7x
topology: tpu7x:2x2x1
jax: 0.10.0
libtpu: 0.0.40
codegen_flags: <defaults>
</compile_context>

<pallas_src>
import functools

import jax
import jax.numpy as jnp
import numpy as np
from jax import lax
from jax.experimental import pallas as pl
from jax.experimental.pallas import tpu as pltpu

NEG_SLOPE = 0.01  # nn.LeakyReLU default negative_slope


def _gemm_bias_lrelu_kernel(p_ref, w_ref, b_ref, o_ref, *, negative_slope):
    """out = LeakyReLU(WpsT @ patches + bias); everything lane-dense along M.

    p_ref: (Kc, tile_m)  im2col patch columns (M on lanes)
    w_ref: (CC, Kc)      pixel-shuffle weight (tiny, constant block index)
    b_ref: (CC, 1)       bias per (phase, Cout) row
    o_ref: (CC, tile_m)  output columns (M on lanes)
    """
    acc = jnp.dot(w_ref[...], p_ref[...], preferred_element_type=jnp.float32)
    acc = acc + b_ref[...].astype(jnp.float32)
    acc = jnp.where(acc >= 0, acc, negative_slope * acc)          # LeakyReLU
    o_ref[...] = acc.astype(o_ref.dtype)                          # no reshape


def _subpixel_axis_plan(in_size, k, s, p, out_size):
    """Pixel-shuffle decomposition plan along one spatial axis.

    For output index o = s*q + r the contributing kernel taps are
    kk = a[r] + s*t (t = 0..T[r]-1) reading input index q + e[r] - t, with
    a[r] = (r + p) % s and e[r] = (r + p) // s.  All phases share a common
    stride-1 window of length J; out-of-range reads hit zero padding.
    Returns (Q, J, taps, pad_lo, pad_hi, off) with taps = [(r, kk, j), ...]
    and patch windows x_pad[q + off + j], j in [0, J).
    """
    Q = (out_size - 1) // s + 1
    a = [(r + p) % s for r in range(s)]
    T = [((k - a[r] + s - 1) // s) if a[r] < k else 0 for r in range(s)]
    e = [(r + p) // s for r in range(s)]
    if not any(T):  # degenerate (padding >= kernel): output is just bias
        return Q, 1, [], 0, max(0, Q - in_size), 0
    lo = min(e[r] - T[r] + 1 for r in range(s) if T[r] > 0)
    hi = max(e[r] for r in range(s) if T[r] > 0)
    J = hi - lo + 1
    pad_lo = max(0, -lo)
    pad_hi = max(0, (Q - 1 + hi) - (in_size - 1))
    off = lo + pad_lo
    taps = []
    for r in range(s):
        for t in range(T[r]):
            taps.append((r, a[r] + s * t, e[r] - t - lo))
    return Q, J, taps, pad_lo, pad_hi, off


def _pixel_shuffle_weight(w, taps_h, taps_w, s, jh, jw):
    """Scatter ConvTranspose2d weights (Cin, Cout, KH, KW) into the transposed
    pixel-shuffle matrix WpsT of shape (CC, Kc) = (s*s*Cout, Jh*Jw*Cin) using a
    single traced gather + mask (scatter plan is static numpy)."""
    cin, cout, kh, kw = w.shape
    cc = s * s * cout
    kc = jh * jw * cin
    idx = np.zeros((cc, kc), np.int32)
    msk = np.zeros((cc, kc), bool)
    ci = np.arange(cin)
    co = np.arange(cout)
    for (ry, ky, jy) in taps_h:
        for (rx, kx, jx) in taps_w:
            rows = (ry * s + rx) * cout + co                       # (Cout,)
            cols = (jy * jw + jx) * cin + ci                       # (Cin,)
            flat = ((ci[:, None] * cout + co[None, :]) * kh + ky) * kw + kx
            idx[np.ix_(rows, cols)] = flat.T                       # (Cout, Cin)
            msk[np.ix_(rows, cols)] = True
    gathered = jnp.take(w.reshape(-1), jnp.asarray(idx))
    return jnp.where(jnp.asarray(msk), gathered, 0.0).astype(w.dtype)


def _choose_tile_m(m, itemsize, kc, cc, budget_bytes=12 << 20, min_steps=2):
    """tile_m (multiple of 128) and padded M: keep 2x(patch tile + out tile)
    (double-buffered pipeline) under budget_bytes, and aim for >= min_steps
    grid steps so megacore sharding has work on both v7x TensorCores."""
    per_col = (kc + cc) * itemsize * 2            # double-buffered in + out tile
    max_cols = max(128, (budget_bytes // per_col) // 128 * 128)
    m128 = pl.cdiv(m, 128) * 128
    tile = min(max_cols, m128)
    if pl.cdiv(m128, tile) < min_steps and m128 >= min_steps * 128:
        tile = max(128, (m128 // min_steps) // 128 * 128)
    m_pad = pl.cdiv(m, tile) * tile
    return tile, m_pad


def leaky_relu_conv_transpose2d(x, w, b, *, stride, padding=0, output_padding=0,
                                negative_slope=NEG_SLOPE):
    """x: (N, Cin, H, W) NCHW; w: (Cin, Cout, KH, KW) (PyTorch ConvTranspose2d);
    b: (Cout,).  Returns LeakyReLU(conv_transpose2d(x) + b) as (N, Cout, OH, OW)."""
    N, Cin, H, W = x.shape
    Cin_w, Cout, KH, KW = w.shape
    assert Cin == Cin_w
    S, P, OP = stride, padding, output_padding

    OH = (H - 1) * S - 2 * P + KH + OP
    OW = (W - 1) * S - 2 * P + KW + OP

    Qh, Jh, taps_h, pbh, pah, offh = _subpixel_axis_plan(H, KH, S, P, OH)
    Qw, Jw, taps_w, pbw, paw, offw = _subpixel_axis_plan(W, KW, S, P, OW)
    Kc = Jh * Jw * Cin
    CC = S * S * Cout
    M = N * Qh * Qw

    # --- glue: zero-pad, shifted-view im2col directly in (Kc, M) layout ------
    # (M = batch * super-rows * super-cols lands on lanes; Kc on sublanes.)
    x_pad = jnp.pad(x, ((0, 0), (0, 0), (pbh, pah), (pbw, paw)))  # (N,Cin,Hp,Wp)
    pieces = [
        x_pad[:, :, offh + jy: offh + jy + Qh, offw + jx: offw + jx + Qw]
        for jy in range(Jh) for jx in range(Jw)
    ]                                                    # each (N, Cin, Qh, Qw)
    patches = jnp.stack(pieces, axis=0)                  # (Jh*Jw, N, Cin, Qh, Qw)
    patches = jnp.transpose(patches, (0, 2, 1, 3, 4)).reshape(Kc, M)

    # --- glue: pixel-shuffle weight (one gather) and per-row bias ------------
    wps_t = _pixel_shuffle_weight(w, taps_h, taps_w, S, Jh, Jw)   # (CC, Kc)
    b_col = jnp.tile(b, S * S).reshape(CC, 1).astype(jnp.float32)

    # --- tiling: M on lanes, multiple of 128, VMEM-budgeted, >= 2 grid steps --
    tile_m, m_pad = _choose_tile_m(M, x.dtype.itemsize, Kc, CC)
    if m_pad != M:
        patches = jnp.pad(patches, ((0, 0), (0, m_pad - M)))
    grid = (m_pad // tile_m,)

    kernel = functools.partial(_gemm_bias_lrelu_kernel,
                               negative_slope=negative_slope)
    cost = pl.CostEstimate(
        flops=2 * m_pad * Kc * CC,
        transcendentals=0,
        bytes_accessed=x.dtype.itemsize * (Kc * m_pad + CC * Kc + CC + CC * m_pad))

    out_cols = pl.pallas_call(
        kernel,
        out_shape=jax.ShapeDtypeStruct((CC, m_pad), x.dtype),
        grid=grid,
        in_specs=[
            pl.BlockSpec((Kc, tile_m), lambda i: (0, i)),   # patches: lane-dense
            pl.BlockSpec((CC, Kc), lambda i: (0, 0)),       # weight: resident
            pl.BlockSpec((CC, 1), lambda i: (0, 0)),        # bias
        ],
        out_specs=pl.BlockSpec((CC, tile_m), lambda i: (0, i)),
        compiler_params=pltpu.CompilerParams(
            dimension_semantics=("parallel",)),
        cost_estimate=cost,
    )(patches, wps_t, b_col)

    # --- glue: pixel-shuffle back to spatial NCHW, trim odd/output_padding edges
    y = out_cols[:, :M].reshape(S, S, Cout, N, Qh, Qw)    # (ry, rx, co, n, qy, qx)
    y = jnp.transpose(y, (3, 2, 4, 0, 5, 1))              # (N, Cout, Qh, S, Qw, S)
    y = y.reshape(N, Cout, Qh * S, Qw * S)[:, :, :OH, :OW]
    return y


def _reference(x, w, b, *, stride, padding, output_padding, negative_slope=NEG_SLOPE):
    """Pure-JAX reference: ConvTranspose2d via lhs-dilated conv, then LeakyReLU."""
    Cin, Cout, KH, KW = w.shape
    rhs = jnp.transpose(jnp.flip(w, axis=(2, 3)), (1, 0, 2, 3))  # (Cout, Cin, KH, KW)
    y = lax.conv_general_dilated(
        x, rhs,
        window_strides=(1, 1),
        padding=[(KH - 1 - padding, KH - 1 - padding + output_padding),
                 (KW - 1 - padding, KW - 1 - padding + output_padding)],
        lhs_dilation=(stride, stride),
        rhs_dilation=(1, 1),
        dimension_numbers=("NCHW", "OIHW", "NCHW"))
    y = y + b[None, :, None, None]
    return jnp.where(y >= 0, y, negative_slope * y)


if __name__ == "__main__":
    # Module config: LeakyReLUConvTranspose2d(n_in=4, n_out=8, kernel_size=4,
    #                                         stride=2, padding=1, output_padding=0)
    N, n_in, n_out = 2, 4, 8
    H = W = 16
    K, stride, padding, output_padding = 4, 2, 1, 0

    key = jax.random.PRNGKey(0)
    kx, kw, kb = jax.random.split(key, 3)
    x = jax.random.normal(kx, (N, n_in, H, W), dtype=jnp.float32)
    # gaussian_weights_init: Conv* weight ~ N(0, 0.02); bias keeps default init.
    w = 0.02 * jax.random.normal(kw, (n_in, n_out, K, K), dtype=jnp.float32)
    bound = 1.0 / np.sqrt(n_in * K * K)
    b = jax.random.uniform(kb, (n_out,), minval=-bound, maxval=bound,
                           dtype=jnp.float32)

    fwd = jax.jit(functools.partial(
        leaky_relu_conv_transpose2d, stride=stride, padding=padding,
        output_padding=output_padding))
    out = jax.block_until_ready(fwd(x, w, b))

    ref = _reference(x, w, b, stride=stride, padding=padding,
                     output_padding=output_padding)
    OH = (H - 1) * stride - 2 * padding + K + output_padding
    OW = (W - 1) * stride - 2 * padding + K + output_padding
    assert out.shape == (N, n_out, OH, OW)
    np.testing.assert_allclose(np.asarray(out), np.asarray(ref),
                               rtol=1e-4, atol=1e-4)

    print("KERNEL_OK")
</pallas_src>

<mosaic_0001>
module attributes {stable_mosaic.version = 11 : i64} {
  func.func @_gemm_bias_lrelu_kernel(%arg0: i32, %arg1: memref<36x256xf32, #tpu.memory_space<vmem>>, %arg2: memref<32x36xf32, #tpu.memory_space<vmem>>, %arg3: memref<32x1xf32, #tpu.memory_space<vmem>>, %arg4: memref<32x256xf32, #tpu.memory_space<vmem>>) attributes {dimension_semantics = [#tpu.dimension_semantics<parallel>], iteration_bounds = array<i64: 2>, scalar_prefetch = 0 : i64, scratch_operands = 0 : i64, tpu.core_type = #tpu.core_type<tc>, window_params = [{transform_indices = @transform_0, window_bounds = array<i64: 36, 256>}, {pipeline_mode = #tpu.pipeline_mode<synchronous>, transform_indices = @transform_1, window_bounds = array<i64: 32, 36>}, {pipeline_mode = #tpu.pipeline_mode<synchronous>, transform_indices = @transform_2, window_bounds = array<i64: 32, 1>}, {transform_indices = @transform_3, window_bounds = array<i64: 32, 256>}]} {
    %c0 = arith.constant 0 : index
    %c0_0 = arith.constant 0 : index
    %0 = vector.load %arg2[%c0, %c0_0] : memref<32x36xf32, #tpu.memory_space<vmem>>, vector<32x36xf32>
    %c0_1 = arith.constant 0 : index
    %c0_2 = arith.constant 0 : index
    %1 = vector.load %arg1[%c0_1, %c0_2] : memref<36x256xf32, #tpu.memory_space<vmem>>, vector<36x256xf32>
    %cst = arith.constant dense<0.000000e+00> : vector<32x256xf32>
    %2 = tpu.matmul %0, %1, %cst {dimension_numbers = #tpu.dot_dimension_numbers<[1], [0], [0], [1], [0, 0, 1, 1], [], []>} : vector<32x36xf32>, vector<36x256xf32>, vector<32x256xf32> -> vector<32x256xf32>
    %c0_3 = arith.constant 0 : index
    %c0_4 = arith.constant 0 : index
    %3 = vector.load %arg3[%c0_3, %c0_4] : memref<32x1xf32, #tpu.memory_space<vmem>>, vector<32x1xf32>
    %4 = vector.broadcast %3 : vector<32x1xf32> to vector<32x256xf32>
    %5 = arith.addf %2, %4 : vector<32x256xf32>
    %cst_5 = arith.constant 0.000000e+00 : f32
    %6 = vector.broadcast %cst_5 : f32 to vector<32x256xf32>
    %7 = arith.cmpf oge, %5, %6 : vector<32x256xf32>
    %cst_6 = arith.constant 0.00999999977 : f32
    %8 = vector.broadcast %cst_6 : f32 to vector<32x256xf32>
    %9 = arith.mulf %8, %5 : vector<32x256xf32>
    %10 = arith.select %7, %5, %9 : vector<32x256xi1>, vector<32x256xf32>
    %c0_7 = arith.constant 0 : index
    %c0_8 = arith.constant 0 : index
    %11 = vector.load %arg4[%c0_7, %c0_8] : memref<32x256xf32, #tpu.memory_space<vmem>>, vector<32x256xf32>
    tpu.vector_store %arg4[%c0_7, %c0_8], %10 {strides = array<i32>} : memref<32x256xf32, #tpu.memory_space<vmem>>, vector<32x256xf32>,
    return
  }
  func.func @transform_0(%arg0: i32) -> (i32, i32) {
    %c0_i32 = arith.constant 0 : i32
    %c0_i32_0 = arith.constant 0 : i32
    return %c0_i32, %arg0 : i32, i32
  }
  func.func @transform_1(%arg0: i32) -> (i32, i32) {
    %c0_i32 = arith.constant 0 : i32
    %c0_i32_0 = arith.constant 0 : i32
    %c0_i32_1 = arith.constant 0 : i32
    return %c0_i32, %c0_i32_0 : i32, i32
  }
  func.func @transform_2(%arg0: i32) -> (i32, i32) {
    %c0_i32 = arith.constant 0 : i32
    %c0_i32_0 = arith.constant 0 : i32
    %c0_i32_1 = arith.constant 0 : i32
    return %c0_i32, %c0_i32_0 : i32, i32
  }
  func.func @transform_3(%arg0: i32) -> (i32, i32) {
    %c0_i32 = arith.constant 0 : i32
    %c0_i32_0 = arith.constant 0 : i32
    return %c0_i32, %arg0 : i32, i32
  }
}

</mosaic_0001>

<bundles_post_ra>
// kernel: tile.0
= control target key start
LH: loop header
LB: loop body
LE: loop exit
PB: predicated region body
PF: predicated region fallthrough
CT: control target
= control target key end

     0   :  { %s66_s8 = smov 125   ;;  %vm7_vm0 = vcmask 7168   ;;  %s67_s11 = smov 126   ;;  %s117_s0 = inlined_call_operand.vmem [shape: f32[4,8], index: 0, kind: input, shape index: {}]   ;;  %s118_s1 = inlined_call_operand.vmem [shape: f32[32,1], index: 1, kind: output, shape index: {}]  }
   0x1   :  { %v4_v0 = vld [vmem:[%s117_s0] sm:$0xf]  ;;  %s65_s0 = smov 127   ;;  %s68_s12 = smov 124  }
   0x2   :  { %5 = vst [vmem:[#allocation0] sm:$0xf] %v4_v0  ;;  %s69_s13 = smov 123   ;;  %s70_s14 = smov 122  }
   0x3   :  { %s71_s15 = smov 121  }
   0x9   :  { %v9_v1 = vld [vmem:[#allocation0] sm:$0xf]  }
   0xa   :  { %v21_v2 = vld [vmem:[#allocation0] sm:$0xf]   ;;  %10 = vrot.lane.b32.xlu0 %v9_v1, %s65_s0 }
   0xb   :  { %22 = vrot.lane.b32.xlu1 %v21_v2, %s66_s8  ;;  %v15_v3 = vld [vmem:[#allocation0] sm:$0xf]  }
   0xc   :  { %v27_v4 = vld [vmem:[#allocation0] sm:$0xf]  }
   0xd   :  { %v6_v5 = vld [vmem:[#allocation0] sm:$0xf]  }
   0xe   :  { %8 = vst.msk [vmem:[%s118_s1] ss:$8 sm:$0xf] %vm7_vm0, %v6_v5   ;;  %16 = vrot.lane.b32.xlu0 %v15_v3, %s67_s11  ;;  %v33_v6 = vld [vmem:[#allocation0] sm:$0xf]  }
   0xf   :  { %28 = vrot.lane.b32.xlu1 %v27_v4, %s68_s12  ;;  %v39_v7 = vld [vmem:[#allocation0] sm:$0xf]  }
  0x10   :  { %v45_v8 = vld [vmem:[#allocation0] sm:$0xf]  }
  0x12   :  { %34 = vrot.lane.b32.xlu0 %v33_v6, %s69_s13 }
  0x13   :  { %40 = vrot.lane.b32.xlu1 %v39_v7, %s70_s14 }
  0x16   :  { %46 = vrot.lane.b32.xlu0 %v45_v8, %s71_s15 }
  0x7c   :  { %v11_v9 = vpop.permute.xlu0 %10  }
  0x7d   :  { %v23_v10 = vpop.permute.xlu1 %22   ;;  %51 = vst.msk [vmem:[%s118_s1 + $0x1] ss:$8 sm:$0xf] %vm7_vm0, %v11_v9  }
  0x7e   :  { %53 = vst.msk [vmem:[%s118_s1 + $0x3] ss:$8 sm:$0xf] %vm7_vm0, %v23_v10  }
  0x80   :  { %v17_v11 = vpop.permute.xlu0 %16  }
  0x81   :  { %v29_v12 = vpop.permute.xlu1 %28   ;;  %52 = vst.msk [vmem:[%s118_s1 + $0x2] ss:$8 sm:$0xf] %vm7_vm0, %v17_v11  }
  0x82   :  { %54 = vst.msk [vmem:[%s118_s1 + $0x4] ss:$8 sm:$0xf] %vm7_vm0, %v29_v12  }
  0x84   :  { %v35_v13 = vpop.permute.xlu0 %34  }
  0x85   :  { %v41_v14 = vpop.permute.xlu1 %40   ;;  %55 = vst.msk [vmem:[%s118_s1 + $0x5] ss:$8 sm:$0xf] %vm7_vm0, %v35_v13  }
  0x86   :  { %56 = vst.msk [vmem:[%s118_s1 + $0x6] ss:$8 sm:$0xf] %vm7_vm0, %v41_v14  }
  0x88   :  { %v47_v15 = vpop.permute.xlu0 %46  }
  0x89   :  { %57 = vst.msk [vmem:[%s118_s1 + $0x7] ss:$8 sm:$0xf] %vm7_vm0, %v47_v15  }

// kernel: tile.8
= control target key start
LH: loop header
LB: loop body
LE: loop exit
PB: predicated region body
PF: predicated region fallthrough
CT: control target
= control target key end

     0   :  { %2 = vsyncpa [#allocation1], 0  ;;  %s44_s6 = smov [#allocation0]   ;;  %s70_s0 = inlined_call_operand.hbm [shape: f32[8], index: 0, kind: input, shape index: {}]   ;;  %s71_s1 = inlined_call_operand.vmem [shape: f32[4,8], index: 1, kind: output, shape index: {}]  }
   0x1   :  { %s9_s7 = sshll.u32 %s44_s6, 4  ;;  %s20_s10 = scalar_lea.hbm %s70_s0, 16  ;;  %s10_s7 = int_to_ptr.vmem [resolvable:$true] %s9_s7 }
   0x2   :  { %p21_p0 = scmp.ne.s32.totalorder %s70_s0, %s20_s10  ;;  %p24_p1 = scmp.lt.u32.totalorder %s20_s10, %s70_s0 }
   0x4   :  { %p26_p2 = pnand %p24_p1, %p21_p0 }
   0x6   :  { %29 = shalt.err (!%p26_p2)
}
   0x7   :  { %s30_s15 = scalar_lea.vmem %s10_s7, 16  ;;  %s34_s16 = scalar_lea.vmem %s10_s7, 32 }
   0x8   :  { %p31_p3 = scmp.ne.s32.totalorder %s10_s7, %s30_s15  ;;  %p35_p4 = scmp.lt.s32.totalorder %s10_s7, %s10_s7 }
   0x9   :  { %p36_p5 = scmp.lt.s32.totalorder %s34_s16, %s30_s15 }
   0xb   :  { %p37_p6 = por %p36_p5, %p35_p4 }
   0xd   :  { %p38_p7 = pnand %p37_p6, %p31_p3 }
   0xf   :  { %41 = shalt.err (!%p38_p7)
}
  0x10   :  { %12 = dma.hbm_to_vmem [thread:$0]  %s70_s0, 16, %s10_s7, [#allocation1]  }
  0x11   :  { %42 = dma.done.wait [#allocation1], 16  }
  0x12   :  { %43 = vsyncadd [#allocation1], 4294967280  ;;  %v16_v0 = vld [vmem:[#allocation0] ss:$0 sm:$0xff] }
  0x13   :  { %17 = vst [vmem:[%s71_s1] sm:$0xf] %v16_v0 }
  0x14   :  { %18 = vsyncpa [#allocation1], 1 }

// kernel: leaky_relu_conv_transpose2d.1
= control target key start
LH: loop header
LB: loop body
LE: loop exit
PB: predicated region body
PF: predicated region fallthrough
CT: control target
= control target key end

     0   :  { %s592_s12 = smov 0   ;;  %s594_s13 = smov 0   ;;  %s698_s0 = inlined_call_operand.vmem [shape: f32[36,512], index: 0, kind: input, shape index: {}]   ;;  %s699_s1 = inlined_call_operand.vmem [shape: f32[32,36], index: 1, kind: input, shape index: {}]   ;;  %s700_s2 = inlined_call_operand.vmem [shape: f32[32,1], index: 2, kind: input, shape index: {}]   ;;  %s701_s3 = inlined_call_operand.vmem [shape: f32[32,512], index: 3, kind: output, shape index: {}]  }
   0x1   :  { %s596_s14 = smov 0  }
   0x2 LB: > { %s481_s15 = sadd.s32 4294967295, %s568_s14   ;;  %s609_s16 = sadd.s32 1, %s568_s14   ;;  %s568_s14 = sphi %s596_s14, %s705_s14   ;;  %s564_s13 = sphi %s594_s13, %s704_s13   ;;  %s560_s12 = sphi %s592_s12, %s703_s12  }
   0x3   : > { %s17_s17 = ssub.s32 %s568_s14, %s609_s16  ;;  %s20_s18 = sadd.s32 1, %s564_s13 }
   0x4   : > { %p18_p0 = scmp.eq.s32.totalorder %s17_s17, 0  ;;  %p27_p1 = scmp.ne.s32.totalorder %s564_s13, %s560_s12 }
   0x5   : > { %p28_p2 = scmp.eq.s32.totalorder %s568_s14, 0  ;;  %p99_p3 = scmp.eq.s32.totalorder %s481_s15, 1 }
   0x6   : > { %s620_s19 = scalar_select %p18_p0, %s564_s13, %s20_s18  }
   0x7   : > { %p29_p4 = por %p28_p2, %p27_p1  ;;  %p622_p5 = por %p99_p3, %p27_p1 }
   0x8   : > { %p484_p6 = scmp.ge.s32.totalorder %s568_s14, 2 }
   0xa   : > { %127 = sbr.rel (%p484_p6) target bundleno = 26 (0x1a), region = 24 }
  0x11   : > { %130 = sbr.rel (!%p29_p4) target bundleno = 26 (0x1a), region = 28  ;;  %s132_s21 = sand.u32 (%p29_p4), 1, %s564_s13  }
  0x12   : > { %s500_s22 = sshll.u32 (%p29_p4), %s568_s14, 4  ;;  %s516_s23 = smul.u32 (%p29_p4), 80, %s132_s21 }
  0x13   : > { %s137_s26 = scalar_lea.vmem (%p29_p4), %s698_s0, %s500_s22 }
  0x14   : > { %v150_v0 = vld [vmem:[%s137_s26] sm:$0xff] (%p29_p4)  ;;  %v152_v1 = vld [vmem:[%s137_s26 + $0x8] sm:$0xff] (%p29_p4)  ;;  %s134_s27 = scalar_lea.vmem (%p29_p4), [#allocation2], %s516_s23 }
  0x15   : > { %v154_v2 = vld [vmem:[%s137_s26 + $0x20] sm:$0xff] (%p29_p4)  ;;  %v156_v3 = vld [vmem:[%s137_s26 + $0x28] sm:$0xff] (%p29_p4)  ;;  %151 = vst [vmem:[%s134_s27] sm:$0xff] (%p29_p4), %v150_v0  ;;  %153 = vst [vmem:[%s134_s27 + $0x8] sm:$0xff] (%p29_p4), %v152_v1 }
  0x16   : > { %v158_v4 = vld [vmem:[%s137_s26 + $0x40] sm:$0xff] (%p29_p4)  ;;  %v160_v5 = vld [vmem:[%s137_s26 + $0x48] sm:$0xff] (%p29_p4)  ;;  %155 = vst [vmem:[%s134_s27 + $0x10] sm:$0xff] (%p29_p4), %v154_v2  ;;  %157 = vst [vmem:[%s134_s27 + $0x18] sm:$0xff] (%p29_p4), %v156_v3 }
  0x17   : > { %159 = vst [vmem:[%s134_s27 + $0x20] sm:$0xff] (%p29_p4), %v158_v4  ;;  %161 = vst [vmem:[%s134_s27 + $0x28] sm:$0xff] (%p29_p4), %v160_v5  ;;  %v162_v6 = vld [vmem:[%s137_s26 + $0x60] sm:$0xff] (%p29_p4)  ;;  %v164_v7 = vld [vmem:[%s137_s26 + $0x68] sm:$0xff] (%p29_p4) }
  0x18   : > { %v166_v8 = vld [vmem:[%s137_s26 + $0x80] sm:$0xff]  ;;  %163 = vst [vmem:[%s134_s27 + $0x30] sm:$0xff] %v162_v6  ;;  %165 = vst [vmem:[%s134_s27 + $0x38] sm:$0xff] %v164_v7  ;;  %v168_v9 = vld [vmem:[%s137_s26 + $0x88] sm:$0xff] }
  0x19   : > { %167 = vst [vmem:[%s134_s27 + $0x40] sm:$0xff] %v166_v8  ;;  %169 = vst [vmem:[%s134_s27 + $0x48] sm:$0xff] %v168_v9 }
  0x1a PF: > { %p487_p7 = scmp.ge.s32.totalorder %s568_s14, 1  ;;  %p174_p8 = scmp.lt.s32.totalorder %s568_s14, 3 }
  0x1c   : > { %p175_p9 = pnand %p487_p7, %p174_p8 }
  0x1d   : > { %s181_s28 = sand.u32 (!%p175_p9), 1, %s560_s12   ;;  %v570_v10 = vmov (!%p175_p9), 0.0   ;;  %v221_v11 = vld [vmem:[%s700_s2 + $0x10] sm:$0xff] (!%p175_p9)  ;;  %v571_v12 = vmov (!%p175_p9), 0   ;;  %v219_v13 = vld [vmem:[%s700_s2] sm:$0xff] (!%p175_p9)  ;;  %v222_v25 = vld [vmem:[%s700_s2 + $0x18] sm:$0xff] (!%p175_p9) }
  0x1e   : > { %178 = sbr.rel (%p175_p9) target bundleno = 280 (0x118), region = 51  ;;  %327 = vmatprep.mubr.f32.mxu0 (!%p175_p9), %v570_v10  ;;  %339 = vmatprep.mubr.f32.mxu1 (!%p175_p9), %v570_v10  ;;  %v220_v26 = vld [vmem:[%s700_s2 + $0x8] sm:$0xff] (!%p175_p9)  ;;  %vm256_vm0 = vcmask (!%p175_p9), 1043456   ;;  %v205_v30 = vld [vmem:[%s699_s1] sm:$0xff] (!%p175_p9)  ;;  %vm243_vm1 = vcmask (!%p175_p9), 293888   ;;  %v207_v31 = vld [vmem:[%s699_s1 + $0x10] sm:$0xff] (!%p175_p9) }
  0x1f   : > { %s517_s29 = smul.u32 (!%p175_p9), 80, %s181_s28  ;;  %545 = vset.pattern.permute.xlu1 (!%p175_p9), %v571_v12  ;;  %544 = vset.pattern.permute.xlu0 (!%p175_p9), %v571_v12  ;;  %v206_v32 = vld [vmem:[%s699_s1 + $0x8] sm:$0xff] (!%p175_p9)  ;;  %v208_v33 = vld [vmem:[%s699_s1 + $0x18] sm:$0xff] (!%p175_p9)  ;;  %s488_s27 = sshll.u32 (!%p175_p9), %s181_s28, 6 }
  0x20   : > { %235 = vperm.xlu1 (!%p175_p9), %545, %v221_v11   ;;  %225 = vperm.xlu0 (!%p175_p9), %544, %v219_v13   ;;  %s663_s12 = scalar_lea.vmem (!%p175_p9), [#allocation3], %s488_s27 }
  0x21   : > { %s183_s7 = scalar_lea.vmem (!%p175_p9), [#allocation2], %s517_s29 }
  0x22   : > { %v210_v14 = vld [vmem:[%s183_s7 + $0x8] sm:$0xff] (!%p175_p9)  ;;  %v212_v15 = vld [vmem:[%s183_s7 + $0x18] sm:$0xff] (!%p175_p9)  ;;  %v209_v16 = vld [vmem:[%s183_s7] sm:$0xff] (!%p175_p9) }
  0x23   : > { %v502_v17 = vpack.c.bf16 (!%p175_p9), %v212_v15, %v210_v14  ;;  %v211_v18 = vld [vmem:[%s183_s7 + $0x10] sm:$0xff] (!%p175_p9)  ;;  %v214_v19 = vld [vmem:[%s183_s7 + $0x28] sm:$0xff] (!%p175_p9)  ;;  %v216_v20 = vld [vmem:[%s183_s7 + $0x38] sm:$0xff] (!%p175_p9) }
  0x24   : > { %v504_v21 = vpack.c.bf16 (!%p175_p9), %v211_v18, %v209_v16  ;;  %v506_v22 = vpack.c.bf16 (!%p175_p9), %v216_v20, %v214_v19  ;;  %v213_v23 = vld [vmem:[%s183_s7 + $0x20] sm:$0xff] (!%p175_p9)  ;;  %v215_v24 = vld [vmem:[%s183_s7 + $0x30] sm:$0xff] (!%p175_p9)  ;;  %v218_v28 = vld [vmem:[%s183_s7 + $0x48] sm:$0xf] (!%p175_p9)  ;;  %240 = vperm.xlu1 (!%p175_p9), %545, %v222_v25   ;;  %230 = vperm.xlu0 (!%p175_p9), %544, %v220_v26  }
  0x25   : > { %503 = vmatprep.subr.bf16.mxu0 %v502_v17  ;;  %510 = vmatprep.subr.bf16.mxu1 %v502_v17  ;;  %v508_v27 = vpack.c.bf16 %v215_v24, %v213_v23  ;;  %v217_v29 = vld [vmem:[%s183_s7 + $0x40] sm:$0xf]  ;;  %s501_s28 = sshll.u32 (%p622_p5), %s481_s15, 4 }
  0x26   : > { %505 = vmatpush1.bf16.msra.mxu0 %v504_v21  ;;  %513 = vmatpush1.bf16.msra.mxu1 %v504_v21  ;;  %s393_s4 = scalar_lea.vmem (%p622_p5), %s701_s3, %s501_s28 }
  0x27   : > { %507 = vmatprep.subr.bf16.mxu0 %v506_v22  ;;  %511 = vmatprep.subr.bf16.mxu1 %v506_v22 }
  0x2a   : > { %509 = vmatpush1.bf16.msra.mxu0 %v508_v27  ;;  %514 = vmatpush1.bf16.msra.mxu1 %v508_v27 }
  0x2b   : > { %489 = vmatprep.subr.msk.mxu0 %vm256_vm0, %v218_v28  ;;  %512 = vmatprep.subr.msk.mxu1 %vm256_vm0, %v218_v28 }
  0x2e   : > { %490 = vmatpush1.msk.msra.mxu0 %vm256_vm0, %v217_v29  ;;  %515 = vmatpush1.msk.msra.mxu1 %vm256_vm0, %v217_v29 }
  0x2f   : > { %491 = vmatmul.mubr.msk.f32.vlgmr.msra.gmra.mrb[0].mxu0 %vm243_vm1, %v205_v30  ;;  %493 = vmatmul.mubr.msk.f32.vlgmr.msra.gmra.mrb[0].mxu1 %vm243_vm1, %v207_v31 }
  0x30   : > { %333 = vmatprep.mubr.f32.mxu0 %v570_v10  ;;  %345 = vmatprep.mubr.f32.mxu1 %v570_v10 }
  0x33   : > { %492 = vmatmul.mubr.msk.f32.gmra.mrb[2].mxu0 %vm243_vm1, %v206_v32  ;;  %494 = vmatmul.mubr.msk.f32.gmra.mrb[2].mxu1 %vm243_vm1, %v208_v33 }
  0x9f   : > { %v236_v34 = vpop.permute.xlu1 %235  ;;  %v226_v35 = vpop.permute.xlu0 %225 }
  0xa3   : > { %v241_v46 = vpop.permute.xlu1 %240  ;;  %v231_v47 = vpop.permute.xlu0 %230 }
 0x102   : > { %v329_v36 = vpop.f32.mrb[0].mxu0  ;;  %v341_v37 = vpop.f32.mrb[0].mxu1 }
 0x103   : > { %v330_v38 = vadd.f32 %v329_v36, %v226_v35  ;;  %v342_v39 = vadd.f32 %v341_v37, %v236_v34  ;;  %v331_v40 = vpop.f32.mrb[1].mxu0  ;;  %v343_v41 = vpop.f32.mrb[1].mxu1 }
 0x104   : > { %v332_v42 = vadd.f32 %v331_v40, %v226_v35  ;;  %v344_v43 = vadd.f32 %v343_v41, %v236_v34 }
 0x105   : > { %vm352_vm2 = vcmp.ge.f32.partialorder %v330_v38, 0.0  ;;  %v360_v44 = vmul.f32 0.01, %v330_v38  ;;  %vm356_vm3 = vcmp.ge.f32.partialorder %v342_v39, 0.0  ;;  %v364_v45 = vmul.f32 0.01, %v342_v39 }
 0x106   : > { %vm353_vm4 = vcmp.ge.f32.partialorder %v332_v42, 0.0  ;;  %v361_v48 = vmul.f32 0.01, %v332_v42  ;;  %vm357_vm5 = vcmp.ge.f32.partialorder %v344_v43, 0.0  ;;  %v365_v49 = vmul.f32 0.01, %v344_v43 }
 0x107   : > { %v368_v50 = vsel %vm352_vm2, %v330_v38, %v360_v44  ;;  %v372_v51 = vsel %vm356_vm3, %v342_v39, %v364_v45  ;;  %v335_v52 = vpop.f32.mrb[2].mxu0  ;;  %v347_v53 = vpop.f32.mrb[2].mxu1 }
 0x108   : > { %376 = vst [vmem:[%s663_s12] sm:$0xff] %v368_v50  ;;  %380 = vst [vmem:[%s663_s12 + $0x20] sm:$0xff] %v372_v51  ;;  %v369_v54 = vsel %vm353_vm4, %v332_v42, %v361_v48  ;;  %v373_v55 = vsel %vm357_vm5, %v344_v43, %v365_v49  ;;  %v336_v56 = vadd.f32 %v335_v52, %v231_v47  ;;  %v337_v58 = vpop.f32.mrb[3].mxu0  ;;  %v349_v59 = vpop.f32.mrb[3].mxu1 }
 0x109   : > { %v348_v57 = vadd.f32 %v347_v53, %v241_v46  ;;  %377 = vst [vmem:[%s663_s12 + $0x8] sm:$0xff] %v369_v54  ;;  %381 = vst [vmem:[%s663_s12 + $0x28] sm:$0xff] %v373_v55  ;;  %v338_v60 = vadd.f32 %v337_v58, %v231_v47  ;;  %v350_v61 = vadd.f32 %v349_v59, %v241_v46  ;;  %390 = sbr.rel (!%p622_p5) target bundleno = 280 (0x118), region = 59 }
 0x10a   : > { %vm354_vm6 = vcmp.ge.f32.partialorder %v336_v56, 0.0  ;;  %v362_v62 = vmul.f32 0.01, %v336_v56 }
 0x10b   : > { %vm358_vm7 = vcmp.ge.f32.partialorder %v348_v57, 0.0  ;;  %v366_v63 = vmul.f32 0.01, %v348_v57  ;;  %vm355_vm8 = vcmp.ge.f32.partialorder %v338_v60, 0.0  ;;  %v363_v0 = vmul.f32 0.01, %v338_v60 }
 0x10c   : > { %vm359_vm9 = vcmp.ge.f32.partialorder %v350_v61, 0.0  ;;  %v367_v1 = vmul.f32 0.01, %v350_v61  ;;  %v370_v2 = vsel %vm354_vm6, %v336_v56, %v362_v62 }
 0x10d   : > { %v374_v3 = vsel %vm358_vm7, %v348_v57, %v366_v63  ;;  %378 = vst [vmem:[%s663_s12 + $0x10] sm:$0xff] %v370_v2  ;;  %v371_v4 = vsel %vm355_vm8, %v338_v60, %v363_v0 }
 0x10e   : > { %382 = vst [vmem:[%s663_s12 + $0x30] sm:$0xff] %v374_v3  ;;  %v375_v5 = vsel %vm359_vm9, %v350_v61, %v367_v1  ;;  %379 = vst [vmem:[%s663_s12 + $0x18] sm:$0xff] %v371_v4 }
 0x10f   : > { %383 = vst [vmem:[%s663_s12 + $0x38] sm:$0xff] %v375_v5  ;;  %v406_v6 = vld [vmem:[%s663_s12] sm:$0xff] (%p622_p5) }
 0x110   : > { %v408_v7 = vld [vmem:[%s663_s12 + $0x8] sm:$0xff]  ;;  %v414_v10 = vld [vmem:[%s663_s12 + $0x20] sm:$0xff]  ;;  %407 = vst [vmem:[%s393_s4] sm:$0xff] %v406_v6 }
 0x111   : > { %v416_v11 = vld [vmem:[%s663_s12 + $0x28] sm:$0xff]  ;;  %409 = vst [vmem:[%s393_s4 + $0x8] sm:$0xff] %v408_v7  ;;  %415 = vst [vmem:[%s393_s4 + $0x40] sm:$0xff] %v414_v10 }
 0x112   : > { %417 = vst [vmem:[%s393_s4 + $0x48] sm:$0xff] %v416_v11 }
 0x114   : > { %v410_v8 = vld [vmem:[%s663_s12 + $0x10] sm:$0xff] }
 0x115   : > { %v412_v9 = vld [vmem:[%s663_s12 + $0x18] sm:$0xff]  ;;  %411 = vst [vmem:[%s393_s4 + $0x20] sm:$0xff] %v410_v8  ;;  %v418_v12 = vld [vmem:[%s663_s12 + $0x30] sm:$0xff] }
 0x116   : > { %413 = vst [vmem:[%s393_s4 + $0x28] sm:$0xff] %v412_v9  ;;  %v420_v13 = vld [vmem:[%s663_s12 + $0x38] sm:$0xff]  ;;  %419 = vst [vmem:[%s393_s4 + $0x60] sm:$0xff] %v418_v12 }
 0x117   : > { %421 = vst [vmem:[%s393_s4 + $0x68] sm:$0xff] %v420_v13 }
 0x118 PF: > { %p10_p10 = scmp.ge.s32.totalorder %s609_s16, 4   ;;  %s703_s12 = smov %s564_s13 }
 0x119   : > { %s704_s13 = smov %s620_s19  ;;  %s705_s14 = smov %s609_s16 }
 0x11a   :  { %12 = sbr.rel (!%p10_p10) target bundleno = 2 (0x2), region = 113 }

</bundles_post_ra>
